<compile_context>
chip_gen: v6e
topology: v6e:2x2x1
jax: 0.10.0
libtpu: 0.0.40
codegen_flags: <defaults>
</compile_context>

<pallas_src>
import functools
import math

import jax
import jax.numpy as jnp
from jax.experimental import pallas as pl
from jax.experimental.pallas import tpu as pltpu

# ----- module config (matches the PyTorch instantiation) -----
INP_DIM = 4            # inp_dim
HID_DIM = 32           # hid_dim
NBLOCKS = 1            # nblocks (=> 3 Linear layers total)
POS_ENC_FREQ = 2       # pos_enc_freq
FEAT_DIM = INP_DIM * (2 * POS_ENC_FREQ + 1)   # pos-enc width = 20
NEG_SLOPE = 0.01       # nn.LeakyReLU default


def _invres_kernel(x_ref, w1_ref, b1_ref, w2_ref, b2_ref, w3_ref, b3_ref,
                   o_ref, feat_ref):
    x = x_ref[...]                                    # (d, TL) f32, feature-major

    # --- LipBoundedPosEnc (nf = 2), double-angle restructuring ---
    a = x * math.pi                                   # pi * x
    s0 = jnp.sin(a)                                   # sin(pi x)
    c0 = jnp.cos(a)                                   # cos(pi x)
    s1 = 2.0 * (s0 * c0)                              # sin(2 pi x)  (VPU only)
    c1 = 1.0 - 2.0 * (s0 * s0)                        # cos(2 pi x)  (VPU only)

    # Stack [s0; s1; c0; c1; x] into one (20, TL) scratch so Linear-1 is a single
    # MXU dot (normalization + original column ordering folded into w1 offline).
    feat_ref[0 * INP_DIM:1 * INP_DIM, :] = s0
    feat_ref[1 * INP_DIM:2 * INP_DIM, :] = s1
    feat_ref[2 * INP_DIM:3 * INP_DIM, :] = c0
    feat_ref[3 * INP_DIM:4 * INP_DIM, :] = c1
    feat_ref[4 * INP_DIM:5 * INP_DIM, :] = x

    # --- Linear 1 + LeakyReLU ---
    h = (jnp.dot(w1_ref[...], feat_ref[...], preferred_element_type=jnp.float32)
         + b1_ref[...])                               # (hid, TL)
    h = jnp.maximum(h, NEG_SLOPE * h)

    # --- Linear 2 + LeakyReLU ---
    h = jnp.dot(w2_ref[...], h, preferred_element_type=jnp.float32) + b2_ref[...]
    h = jnp.maximum(h, NEG_SLOPE * h)

    # --- Linear 3 ---
    g = jnp.dot(w3_ref[...], h, preferred_element_type=jnp.float32) + b3_ref[...]

    # --- residual, lane-dense store ---
    o_ref[...] = x + g


def _spectral_normalize(w):
    # PyTorch's nn.utils.spectral_norm divides by the top singular value estimated
    # with power iteration; here we use the exact sigma_max (offline, not in-kernel).
    sigma = jnp.linalg.svd(w, compute_uv=False)[0]
    return w / sigma


def make_params():
    """Deterministic synthetic parameters in PyTorch convention: W is (out, in)."""
    key = jax.random.PRNGKey(42)
    ks = jax.random.split(key, 6)

    def linear(kw, kb, fan_in, fan_out):
        bound = 1.0 / math.sqrt(fan_in)
        w = jax.random.uniform(kw, (fan_out, fan_in), jnp.float32, -bound, bound)
        b = jax.random.uniform(kb, (fan_out,), jnp.float32, -bound, bound)
        return _spectral_normalize(w), b

    w1, b1 = linear(ks[0], ks[1], FEAT_DIM, HID_DIM)
    w2, b2 = linear(ks[2], ks[3], HID_DIM, HID_DIM)
    w3, b3 = linear(ks[4], ks[5], HID_DIM, INP_DIM)
    return (w1, b1, w2, b2, w3, b3)


def prepare_kernel_params(params):
    """Fold pos-enc normalization + PyTorch column ordering into one stacked W1.

    Kernel feature-row order (matches the scratch layout in _invres_kernel):
      rows  0.. 3: sin(pi   x_i)      rows  4.. 7: sin(2 pi x_i)
      rows  8..11: cos(pi   x_i)      rows 12..15: cos(2 pi x_i)
      rows 16..19: x_i
    """
    w1, b1, w2, b2, w3, b3 = params
    d, nf = INP_DIM, POS_ENC_FREQ
    assert nf == 2, "double-angle restructuring in the kernel assumes pos_enc_freq=2"
    sqrt_norm = math.sqrt(2 * nf + 1)
    pi = math.pi

    # Original pos-enc per-feature block: col 2*nf*i + k -> sin(c_k x_i),
    # col 2*nf*i + nf + k -> cos(c_k x_i), with c_k = 2^k * pi; raw x is last.
    def cols(offset):
        return jnp.array([2 * nf * i + offset for i in range(d)], dtype=jnp.int32)

    w1_cat = jnp.concatenate([
        w1[:, cols(0)] / (pi * sqrt_norm),             # sin(pi x)
        w1[:, cols(1)] / (2.0 * pi * sqrt_norm),       # sin(2 pi x)
        w1[:, cols(nf + 0)] / (pi * sqrt_norm),        # cos(pi x)
        w1[:, cols(nf + 1)] / (2.0 * pi * sqrt_norm),  # cos(2 pi x)
        w1[:, 2 * nf * d:] / sqrt_norm,                # raw x
    ], axis=1)                                         # (hid, 20)

    return (w1_cat, b1.reshape(-1, 1), w2, b2.reshape(-1, 1), w3, b3.reshape(-1, 1))


@functools.partial(jax.jit, static_argnames=("tile_cols",))
def invertible_resblock_linear(x, kparams, *, tile_cols=8192):
    """x: (bs, npts, INP_DIM) f32. Returns x + g(x), same shape."""
    w1, b1, w2, b2, w3, b3 = kparams
    bs, npts, d = x.shape
    assert d == INP_DIM
    n = bs * npts

    # Feature-major layout for the kernel (lane-dense intermediates & stores).
    # This transpose (and the one on the way out) is the only wrapper-side HBM
    # traffic; there is no pad / slice pass any more.
    x_fm = x.reshape(n, d).T                           # (d, n)

    # Lane tile: multiple of 128, never larger than the whole lane axis; the ragged
    # last tile uses Pallas' clipped boundary blocks (garbage reads are per-column
    # isolated, out-of-bounds writes are dropped). Tiny inputs use one full block.
    if n < 128:
        tl = n
    else:
        tl = max(128, min((int(tile_cols) // 128) * 128, (n // 128) * 128))
    grid = (pl.cdiv(n, tl),)

    full = lambda a: pl.BlockSpec(a.shape, lambda i: (0, 0))   # fetched once

    out_fm = pl.pallas_call(
        _invres_kernel,
        out_shape=jax.ShapeDtypeStruct((d, n), jnp.float32),
        grid_spec=pltpu.PrefetchScalarGridSpec(
            num_scalar_prefetch=0,
            grid=grid,
            in_specs=[
                pl.BlockSpec((d, tl), lambda i: (0, i)),       # x tile (lane-tiled)
                full(w1), full(b1), full(w2), full(b2), full(w3), full(b3),
            ],
            out_specs=pl.BlockSpec((d, tl), lambda i: (0, i)),
            scratch_shapes=[pltpu.VMEM((FEAT_DIM, tl), jnp.float32)],
        ),
        # Independent lane tiles; shards across TensorCores where supported.
        # TODO(synk): verify 2-TC sharding on v7x profiles (CORE_PARALLEL if not).
        compiler_params=pltpu.CompilerParams(
            dimension_semantics=("parallel",)),
    )(x_fm, w1, b1, w2, b2, w3, b3)

    return out_fm.T.reshape(bs, npts, d)


def reference_forward(x, params):
    """Pure-JAX mirror of the PyTorch forward (original, unsplit weights)."""
    w1, b1, w2, b2, w3, b3 = params
    bs, npts, d = x.shape
    nf = POS_ENC_FREQ
    const = (2.0 ** jnp.arange(nf, dtype=jnp.float32)) * jnp.pi
    arg = x[..., None] * const                                     # (bs,npts,d,nf)
    feat = jnp.concatenate([jnp.sin(arg), jnp.cos(arg)], axis=-1)  # (bs,npts,d,2nf)
    feat = feat.reshape(bs, npts, 2 * d * nf)
    const_norm = jnp.tile(jnp.concatenate([const, const]), (d,))
    const_norm = jnp.concatenate([const_norm, jnp.ones((d,), jnp.float32)])
    out = jnp.concatenate([feat, x], axis=-1) / const_norm / math.sqrt(2 * nf + 1)
    y = out @ w1.T + b1
    y = jnp.where(y > 0, y, NEG_SLOPE * y)
    y = y @ w2.T + b2
    y = jnp.where(y > 0, y, NEG_SLOPE * y)
    y = y @ w3.T + b3
    return x + y


if __name__ == "__main__":
    params = make_params()
    kparams = prepare_kernel_params(params)

    # Small shape consistent with the module: (bs, npts, inp_dim) = (2, 8, 4).
    x = jax.random.normal(jax.random.PRNGKey(0), (2, 8, INP_DIM), dtype=jnp.float32)
    out = jax.block_until_ready(invertible_resblock_linear(x, kparams))
    ref = reference_forward(x, params)
    assert out.shape == x.shape
    assert jnp.allclose(out, ref, rtol=1e-4, atol=1e-4), \
        f"mismatch (small): max abs err {jnp.max(jnp.abs(out - ref))}"

    # Larger, non-128-divisible point count: exercises a clipped boundary block.
    x2 = jax.random.normal(jax.random.PRNGKey(1), (4, 700, INP_DIM), dtype=jnp.float32)
    ref2 = reference_forward(x2, params)
    out2 = jax.block_until_ready(invertible_resblock_linear(x2, kparams))
    assert out2.shape == x2.shape
    assert jnp.allclose(out2, ref2, rtol=1e-4, atol=1e-4), \
        f"mismatch (large, default tile): max abs err {jnp.max(jnp.abs(out2 - ref2))}"

    # Same input with a small tile: multi-step grid + ragged last tile + weight reuse.
    out3 = jax.block_until_ready(
        invertible_resblock_linear(x2, kparams, tile_cols=512))
    assert jnp.allclose(out3, ref2, rtol=1e-4, atol=1e-4), \
        f"mismatch (large, tile=512): max abs err {jnp.max(jnp.abs(out3 - ref2))}"

    print("KERNEL_OK")
</pallas_src>

<mosaic_0001>
module attributes {stable_mosaic.version = 11 : i64} {
  func.func @_invres_kernel(%arg0: i32, %arg1: memref<4x16xf32, #tpu.memory_space<vmem>>, %arg2: memref<32x20xf32, #tpu.memory_space<vmem>>, %arg3: memref<32x1xf32, #tpu.memory_space<vmem>>, %arg4: memref<32x32xf32, #tpu.memory_space<vmem>>, %arg5: memref<32x1xf32, #tpu.memory_space<vmem>>, %arg6: memref<4x32xf32, #tpu.memory_space<vmem>>, %arg7: memref<4x1xf32, #tpu.memory_space<vmem>>, %arg8: memref<4x16xf32, #tpu.memory_space<vmem>>, %arg9: memref<20x16xf32, #tpu.memory_space<vmem>>) attributes {dimension_semantics = [#tpu.dimension_semantics<parallel>], iteration_bounds = array<i64: 1>, scalar_prefetch = 0 : i64, scratch_operands = 1 : i64, tpu.core_type = #tpu.core_type<tc>, window_params = [{transform_indices = @transform_0, window_bounds = array<i64: 4, 16>}, {pipeline_mode = #tpu.pipeline_mode<synchronous>, transform_indices = @transform_1, window_bounds = array<i64: 32, 20>}, {pipeline_mode = #tpu.pipeline_mode<synchronous>, transform_indices = @transform_2, window_bounds = array<i64: 32, 1>}, {pipeline_mode = #tpu.pipeline_mode<synchronous>, transform_indices = @transform_3, window_bounds = array<i64: 32, 32>}, {pipeline_mode = #tpu.pipeline_mode<synchronous>, transform_indices = @transform_4, window_bounds = array<i64: 32, 1>}, {pipeline_mode = #tpu.pipeline_mode<synchronous>, transform_indices = @transform_5, window_bounds = array<i64: 4, 32>}, {pipeline_mode = #tpu.pipeline_mode<synchronous>, transform_indices = @transform_6, window_bounds = array<i64: 4, 1>}, {transform_indices = @transform_7, window_bounds = array<i64: 4, 16>}]} {
    %c0 = arith.constant 0 : index
    %c0_0 = arith.constant 0 : index
    %0 = vector.load %arg1[%c0, %c0_0] : memref<4x16xf32, #tpu.memory_space<vmem>>, vector<4x16xf32>
    %cst = arith.constant 3.14159274 : f32
    %1 = vector.broadcast %cst : f32 to vector<4x16xf32>
    %2 = arith.mulf %0, %1 : vector<4x16xf32>
    %3 = math.sin %2 : vector<4x16xf32>
    %4 = math.cos %2 : vector<4x16xf32>
    %5 = arith.mulf %3, %4 : vector<4x16xf32>
    %cst_1 = arith.constant 2.000000e+00 : f32
    %6 = vector.broadcast %cst_1 : f32 to vector<4x16xf32>
    %7 = arith.mulf %6, %5 : vector<4x16xf32>
    %8 = arith.mulf %3, %3 : vector<4x16xf32>
    %cst_2 = arith.constant 2.000000e+00 : f32
    %9 = vector.broadcast %cst_2 : f32 to vector<4x16xf32>
    %10 = arith.mulf %9, %8 : vector<4x16xf32>
    %cst_3 = arith.constant 1.000000e+00 : f32
    %11 = vector.broadcast %cst_3 : f32 to vector<4x16xf32>
    %12 = arith.subf %11, %10 : vector<4x16xf32>
    %c0_4 = arith.constant 0 : index
    %c0_5 = arith.constant 0 : index
    %13 = vector.load %arg9[%c0_4, %c0_5] : memref<20x16xf32, #tpu.memory_space<vmem>>, vector<4x16xf32>
    tpu.vector_store %arg9[%c0_4, %c0_5], %3 {strides = array<i32>} : memref<20x16xf32, #tpu.memory_space<vmem>>, vector<4x16xf32>,
    %c4 = arith.constant 4 : index
    %c0_6 = arith.constant 0 : index
    %14 = vector.load %arg9[%c4, %c0_6] : memref<20x16xf32, #tpu.memory_space<vmem>>, vector<4x16xf32>
    tpu.vector_store %arg9[%c4, %c0_6], %7 {strides = array<i32>} : memref<20x16xf32, #tpu.memory_space<vmem>>, vector<4x16xf32>,
    %c8 = arith.constant 8 : index
    %c0_7 = arith.constant 0 : index
    %15 = vector.load %arg9[%c8, %c0_7] : memref<20x16xf32, #tpu.memory_space<vmem>>, vector<4x16xf32>
    tpu.vector_store %arg9[%c8, %c0_7], %4 {strides = array<i32>} : memref<20x16xf32, #tpu.memory_space<vmem>>, vector<4x16xf32>,
    %c12 = arith.constant 12 : index
    %c0_8 = arith.constant 0 : index
    %16 = vector.load %arg9[%c12, %c0_8] : memref<20x16xf32, #tpu.memory_space<vmem>>, vector<4x16xf32>
    tpu.vector_store %arg9[%c12, %c0_8], %12 {strides = array<i32>} : memref<20x16xf32, #tpu.memory_space<vmem>>, vector<4x16xf32>,
    %c16 = arith.constant 16 : index
    %c0_9 = arith.constant 0 : index
    %17 = vector.load %arg9[%c16, %c0_9] : memref<20x16xf32, #tpu.memory_space<vmem>>, vector<4x16xf32>
    tpu.vector_store %arg9[%c16, %c0_9], %0 {strides = array<i32>} : memref<20x16xf32, #tpu.memory_space<vmem>>, vector<4x16xf32>,
    %c0_10 = arith.constant 0 : index
    %c0_11 = arith.constant 0 : index
    %18 = vector.load %arg2[%c0_10, %c0_11] : memref<32x20xf32, #tpu.memory_space<vmem>>, vector<32x20xf32>
    %c0_12 = arith.constant 0 : index
    %c0_13 = arith.constant 0 : index
    %19 = vector.load %arg9[%c0_12, %c0_13] : memref<20x16xf32, #tpu.memory_space<vmem>>, vector<20x16xf32>
    %cst_14 = arith.constant dense<0.000000e+00> : vector<32x16xf32>
    %20 = tpu.matmul %18, %19, %cst_14 {dimension_numbers = #tpu.dot_dimension_numbers<[1], [0], [0], [1], [0, 0, 1, 1], [], []>} : vector<32x20xf32>, vector<20x16xf32>, vector<32x16xf32> -> vector<32x16xf32>
    %c0_15 = arith.constant 0 : index
    %c0_16 = arith.constant 0 : index
    %21 = vector.load %arg3[%c0_15, %c0_16] : memref<32x1xf32, #tpu.memory_space<vmem>>, vector<32x1xf32>
    %22 = vector.broadcast %21 : vector<32x1xf32> to vector<32x16xf32>
    %23 = arith.addf %20, %22 : vector<32x16xf32>
    %cst_17 = arith.constant 0.00999999977 : f32
    %24 = vector.broadcast %cst_17 : f32 to vector<32x16xf32>
    %25 = arith.mulf %24, %23 : vector<32x16xf32>
    %26 = arith.maximumf %23, %25 : vector<32x16xf32>
    %c0_18 = arith.constant 0 : index
    %c0_19 = arith.constant 0 : index
    %27 = vector.load %arg4[%c0_18, %c0_19] : memref<32x32xf32, #tpu.memory_space<vmem>>, vector<32x32xf32>
    %cst_20 = arith.constant dense<0.000000e+00> : vector<32x16xf32>
    %28 = tpu.matmul %27, %26, %cst_20 {dimension_numbers = #tpu.dot_dimension_numbers<[1], [0], [0], [1], [0, 0, 1, 1], [], []>} : vector<32x32xf32>, vector<32x16xf32>, vector<32x16xf32> -> vector<32x16xf32>
    %c0_21 = arith.constant 0 : index
    %c0_22 = arith.constant 0 : index
    %29 = vector.load %arg5[%c0_21, %c0_22] : memref<32x1xf32, #tpu.memory_space<vmem>>, vector<32x1xf32>
    %30 = vector.broadcast %29 : vector<32x1xf32> to vector<32x16xf32>
    %31 = arith.addf %28, %30 : vector<32x16xf32>
    %cst_23 = arith.constant 0.00999999977 : f32
    %32 = vector.broadcast %cst_23 : f32 to vector<32x16xf32>
    %33 = arith.mulf %32, %31 : vector<32x16xf32>
    %34 = arith.maximumf %31, %33 : vector<32x16xf32>
    %c0_24 = arith.constant 0 : index
    %c0_25 = arith.constant 0 : index
    %35 = vector.load %arg6[%c0_24, %c0_25] : memref<4x32xf32, #tpu.memory_space<vmem>>, vector<4x32xf32>
    %cst_26 = arith.constant dense<0.000000e+00> : vector<4x16xf32>
    %36 = tpu.matmul %35, %34, %cst_26 {dimension_numbers = #tpu.dot_dimension_numbers<[1], [0], [0], [1], [0, 0, 1, 1], [], []>} : vector<4x32xf32>, vector<32x16xf32>, vector<4x16xf32> -> vector<4x16xf32>
    %c0_27 = arith.constant 0 : index
    %c0_28 = arith.constant 0 : index
    %37 = vector.load %arg7[%c0_27, %c0_28] : memref<4x1xf32, #tpu.memory_space<vmem>>, vector<4x1xf32>
    %38 = vector.broadcast %37 : vector<4x1xf32> to vector<4x16xf32>
    %39 = arith.addf %36, %38 : vector<4x16xf32>
    %40 = arith.addf %0, %39 : vector<4x16xf32>
    %c0_29 = arith.constant 0 : index
    %c0_30 = arith.constant 0 : index
    %41 = vector.load %arg8[%c0_29, %c0_30] : memref<4x16xf32, #tpu.memory_space<vmem>>, vector<4x16xf32>
    tpu.vector_store %arg8[%c0_29, %c0_30], %40 {strides = array<i32>} : memref<4x16xf32, #tpu.memory_space<vmem>>, vector<4x16xf32>,
    return
  }
  func.func @transform_0(%arg0: i32) -> (i32, i32) {
    %c0_i32 = arith.constant 0 : i32
    %c0_i32_0 = arith.constant 0 : i32
    return %c0_i32, %arg0 : i32, i32
  }
  func.func @transform_1(%arg0: i32) -> (i32, i32) {
    %c0_i32 = arith.constant 0 : i32
    %c0_i32_0 = arith.constant 0 : i32
    %c0_i32_1 = arith.constant 0 : i32
    return %c0_i32, %c0_i32_0 : i32, i32
  }
  func.func @transform_2(%arg0: i32) -> (i32, i32) {
    %c0_i32 = arith.constant 0 : i32
    %c0_i32_0 = arith.constant 0 : i32
    %c0_i32_1 = arith.constant 0 : i32
    return %c0_i32, %c0_i32_0 : i32, i32
  }
  func.func @transform_3(%arg0: i32) -> (i32, i32) {
    %c0_i32 = arith.constant 0 : i32
    %c0_i32_0 = arith.constant 0 : i32
    %c0_i32_1 = arith.constant 0 : i32
    return %c0_i32, %c0_i32_0 : i32, i32
  }
  func.func @transform_4(%arg0: i32) -> (i32, i32) {
    %c0_i32 = arith.constant 0 : i32
    %c0_i32_0 = arith.constant 0 : i32
    %c0_i32_1 = arith.constant 0 : i32
    return %c0_i32, %c0_i32_0 : i32, i32
  }
  func.func @transform_5(%arg0: i32) -> (i32, i32) {
    %c0_i32 = arith.constant 0 : i32
    %c0_i32_0 = arith.constant 0 : i32
    %c0_i32_1 = arith.constant 0 : i32
    return %c0_i32, %c0_i32_0 : i32, i32
  }
  func.func @transform_6(%arg0: i32) -> (i32, i32) {
    %c0_i32 = arith.constant 0 : i32
    %c0_i32_0 = arith.constant 0 : i32
    %c0_i32_1 = arith.constant 0 : i32
    return %c0_i32, %c0_i32_0 : i32, i32
  }
  func.func @transform_7(%arg0: i32) -> (i32, i32) {
    %c0_i32 = arith.constant 0 : i32
    %c0_i32_0 = arith.constant 0 : i32
    return %c0_i32, %arg0 : i32, i32
  }
}

</mosaic_0001>

<bundles_post_ra>
// kernel: invertible_resblock_linear.1
= control target key start
LH: loop header
LB: loop body
LE: loop exit
PB: predicated region body
PF: predicated region fallthrough
CT: control target
= control target key end

     0   :  { %vm240_vm0 = vcmask 125952   ;;  %vm277_vm1 = vcmask 162816   ;;  %v701_v4 = vmov 0   ;;  %vm290_vm2 = vcmask 1043456   ;;  %s851_s0 = inlined_call_operand.vmem [shape: f32[4,16], index: 0, kind: input, shape index: {}]   ;;  %s852_s1 = inlined_call_operand.vmem [shape: f32[32,20], index: 1, kind: input, shape index: {}]   ;;  %s853_s2 = inlined_call_operand.vmem [shape: f32[32,1], index: 2, kind: input, shape index: {}]   ;;  %s854_s4 = inlined_call_operand.vmem [shape: f32[32,1], index: 4, kind: input, shape index: {}]   ;;  %s855_s6 = inlined_call_operand.vmem [shape: f32[4,1], index: 6, kind: input, shape index: {}]   ;;  %s856_s3 = inlined_call_operand.vmem [shape: f32[32,32], index: 3, kind: input, shape index: {}]   ;;  %s857_s5 = inlined_call_operand.vmem [shape: f32[4,32], index: 5, kind: input, shape index: {}]   ;;  %s858_s7 = inlined_call_operand.vmem [shape: f32[4,16], index: 7, kind: output, shape index: {}]  }
   0x1   :  { %v753_v0 = vld [vmem:[%s851_s0] sm:$0xf]  ;;  %695 = vset.pattern.permute.xlu0 %v701_v4  ;;  %v256_v5 = vld [vmem:[%s853_s2 + $0x18] sm:$0xff]  ;;  %696 = vset.pattern.permute.xlu1 %v701_v4  ;;  %v254_v6 = vld [vmem:[%s853_s2 + $0x8] sm:$0xff]  ;;  %v702_v24 = vmov 683565275  }
   0x2   :  { %v756_v1 = vmul.f32 3.1415927, %v753_v0  ;;  %245 = vst.msk [vmem:[#allocation2 + $0x10] sm:$0xf] %vm240_vm0, %v753_v0  ;;  %v246_v2 = vld [vmem:[%s852_s1] sm:$0xff]  ;;  %274 = vperm.xlu0 %695, %v256_v5   ;;  %v255_v8 = vld [vmem:[%s853_s2 + $0x10] sm:$0xff]  ;;  %264 = vperm.xlu1 %696, %v254_v6  }
   0x3   :  { %651 = vmatprep.mubr.msk.f32.mxu0 %vm277_vm1, %v246_v2  ;;  %v253_v10 = vld [vmem:[%s853_s2] sm:$0xff]  ;;  %v394_v14 = vld [vmem:[%s854_s4 + $0x18] sm:$0xff]  ;;  %v393_v16 = vld [vmem:[%s854_s4 + $0x10] sm:$0xff]  ;;  %v703_v26 = vmov 2475754826  }
   0x4   :  { %v31_v3 = vand.u32 2139095040, %v756_v1  ;;  %v28_v9 = vand.u32 2147483647, %v756_v1  ;;  %v392_v19 = vld [vmem:[%s854_s4 + $0x8] sm:$0xff]  ;;  %v391_v22 = vld [vmem:[%s854_s4] sm:$0xff]  ;;  %vm30_vm10 = vcmp.lt.s32.totalorder %v756_v1, 0 }
   0x5   :  { %v704_v28 = vmov 2131351028   ;;  %v705_v30 = vmov 2102212464   ;;  %v706_v32 = vmov 920167782  }
   0x6   :  { %v32_v7 = vshrl.u32 %v31_v3, 23  ;;  %269 = vperm.xlu0 %695, %v255_v8   ;;  %259 = vperm.xlu1 %696, %v253_v10   ;;  %v35_v15 = vand.u32 8388607, %v28_v9  ;;  %v522_v38 = vld [vmem:[%s855_s6] sm:$0xf] }
   0x7   :  { %v707_v40 = vmov 1326507024   ;;  %vm29_vm11 = vcmp.le.f32.partialorder %v28_v9, 0.7853982 }
   0x8   :  { %v607_v11 = vadd.s32 4294967169, %v32_v7  ;;  %v36_v21 = vor.u32 8388608, %v35_v15 }
   0x9   :  { %v252_v12 = vld [vmem:[#allocation2 + $0x10] sm:$0xf] }
   0xa   :  { %v38_v13 = vadd.s32 1, %v607_v11  ;;  %645 = vmatprep.subr.msk.mxu0 %vm290_vm2, %v252_v12  ;;  %412 = vperm.xlu0 %695, %v394_v14   ;;  %v76_v42 = vshll.u32 %v36_v21, 8 }
   0xb   :  { %646 = vmatpush3.msk.msra.mxu0 %vm290_vm2, %v252_v12  ;;  %407 = vperm.xlu1 %696, %v393_v16  }
   0xc   :  { %vm39_vm3 = vcmp.gt.s32.totalorder %v38_v13, 0 }
   0xd   :  { %v40_v17 = vsel %vm39_vm3, %v38_v13, 0 }
   0xe   :  { %v42_v18 = vand.u32 31, %v40_v17  ;;  %v41_v20 = vshrl.u32 %v40_v17, 5  ;;  %402 = vperm.xlu0 %695, %v392_v19  }
   0xf   :  { %397 = vperm.xlu1 %696, %v391_v22  }
  0x10   :  { %v43_v23 = vsub.s32 32, %v42_v18  ;;  %v45_v25 = vshll.u32 %v702_v24, %v42_v18  ;;  %v48_v27 = vshll.u32 %v703_v26, %v42_v18  ;;  %v51_v29 = vshll.u32 %v704_v28, %v42_v18 }
  0x11   :  { %v54_v31 = vshll.u32 %v705_v30, %v42_v18  ;;  %v57_v33 = vshll.u32 %v706_v32, %v42_v18  ;;  %vm60_vm4 = vcmp.lt.s32.totalorder %v41_v20, 1  ;;  %vm63_vm5 = vcmp.lt.s32.totalorder %v41_v20, 4 }
  0x12   :  { %v44_v34 = vshrl.u32 %v702_v24, %v43_v23  ;;  %v46_v35 = vshrl.u32 %v703_v26, %v43_v23  ;;  %v49_v36 = vshrl.u32 %v704_v28, %v43_v23  ;;  %v52_v37 = vshrl.u32 %v705_v30, %v43_v23  ;;  %525 = vperm.xlu0 %695, %v522_v38  }
  0x13   :  { %v55_v39 = vshrl.u32 %v706_v32, %v43_v23  ;;  %v58_v41 = vshrl.u32 %v707_v40, %v43_v23  ;;  %vm61_vm6 = vcmp.lt.s32.totalorder %v41_v20, 2  ;;  %vm62_vm7 = vcmp.lt.s32.totalorder %v41_v20, 3 }
  0x14   :  { %v47_v43 = vor.u32 %v46_v35, %v45_v25  ;;  %v50_v44 = vor.u32 %v49_v36, %v48_v27  ;;  %v53_v45 = vor.u32 %v52_v37, %v51_v29 }
  0x15   :  { %v56_v46 = vor.u32 %v55_v39, %v54_v31  ;;  %v59_v47 = vor.u32 %v58_v41, %v57_v33 }
  0x16   :  { %v64_v48 = vsel %vm60_vm4, %v44_v34, %v47_v43  ;;  %v65_v49 = vsel %vm63_vm5, %v53_v45, 2102212464  ;;  %v68_v50 = vsel %vm60_vm4, %v47_v43, %v50_v44  ;;  %v72_v51 = vsel %vm60_vm4, %v50_v44, %v53_v45 }
  0x17   :  { %v66_v52 = vsel %vm62_vm7, %v50_v44, %v65_v49  ;;  %v69_v53 = vsel %vm63_vm5, %v56_v46, 920167782  ;;  %v73_v54 = vsel %vm63_vm5, %v59_v47, 1326507024  ;;  %vm120_vm4 = vweird.f32 %v756_v1 }
  0x18   :  { %v70_v55 = vsel %vm62_vm7, %v53_v45, %v69_v53  ;;  %v74_v56 = vsel %vm62_vm7, %v56_v46, %v73_v54  ;;  %v67_v57 = vsel %vm61_vm6, %v64_v48, %v66_v52  ;;  %v247_v54 = vld [vmem:[%s852_s1 + $0x8] sm:$0xff]  ;;  %vm415_vm5 = vcmask 261120  }
  0x19   :  { %v71_v58 = vsel %vm61_vm6, %v68_v50, %v70_v55  ;;  %v75_v59 = vsel %vm61_vm6, %v72_v51, %v74_v56  ;;  %v83_v2 = vmul.u32 %v76_v42, %v67_v57  ;;  %v248_v55 = vld [vmem:[%s852_s1 + $0x10] sm:$0xff]  ;;  %v249_v56 = vld [vmem:[%s852_s1 + $0x18] sm:$0xff]  ;;  %v387_v57 = vld [vmem:[%s856_s3] sm:$0xff] }
  0x1a   :  { %v795_v60 = vmul.u32.u64.low %v76_v42, %v75_v59  ;;  %v796_v61 = vmul.u32.u64.high %v76_v42, %v75_v59, %v795_v60  ;;  %v798_v62 = vmul.u32.u64.low %v76_v42, %v71_v58  ;;  %v799_v63 = vmul.u32.u64.high %v76_v42, %v71_v58, %v798_v62  ;;  %665 = vmatprep.mubr.msk.f32.mxu1 %vm415_vm5, %v387_v57 }
  0x1c   :  { %vm85_vm8 = vc.u32 %v796_v61, %v798_v62  ;;  %v86_v3 = vadd.s32 1, %v799_v63  ;;  %v84_v15 = vadd.s32 %v798_v62, %v796_v61 }
  0x1e   :  { %v87_v4 = vsel %vm85_vm8, %v86_v3, %v799_v63 }
  0x1f   :  { %v88_v5 = vadd.s32 %v87_v4, %v83_v2 }
  0x21   :  { %v89_v6 = vadd.s32 536870912, %v88_v5 }
  0x23   :  { %v90_v7 = vshrl.u32 %v89_v6, 30 }
  0x25   :  { %v91_v8 = vshll.u32 %v90_v7, 30  ;;  %v114_v28 = vsub.s32 4, %v90_v7 }
  0x27   :  { %v92_v10 = vsub.s32 %v88_v5, %v91_v8  ;;  %v115_v31 = vsel %vm30_vm10, %v114_v28, %v90_v7 }
  0x28   :  { %v117_v33 = vsel %vm29_vm11, 0, %v115_v31 }
  0x29   :  { %v94_v11 = vsub.s32 0, %v92_v10  ;;  %v121_v34 = vadd.s32 3, %v117_v33  ;;  %v225_v36 = vand.u32 3, %v117_v33 }
  0x2b   :  { %v608_v12 = vmin.u32 %v94_v11, %v92_v10  ;;  %v122_v35 = vand.u32 3, %v121_v34  ;;  %vm230_vm13 = vcmp.eq.s32.totalorder %v225_v36, 2  ;;  %vm227_vm15 = vcmp.eq.s32.totalorder %v225_v36, 0 }
  0x2c   :  { %vm226_vm3 = vcmp.lt.s32.totalorder %v225_v36, 2 }
  0x2d   :  { %v96_v13 = vclz %v608_v12  ;;  %vm127_vm12 = vcmp.eq.s32.totalorder %v122_v35, 2  ;;  %vm124_vm14 = vcmp.eq.s32.totalorder %v122_v35, 0  ;;  %vm123_vm2 = vcmp.lt.s32.totalorder %v122_v35, 2 }
  0x2f   :  { %v609_v14 = vadd.s32 4294967294, %v96_v13 }
  0x31   :  { %vm610_vm9 = vcmp.lt.s32.totalorder %v609_v14, 0 }
  0x32   :  { %v99_v16 = vsel %vm610_vm9, 0, %v609_v14 }
  0x33   :  { %v100_v17 = vsub.s32 32, %v99_v16  ;;  %v101_v18 = vshll.u32 %v92_v10, %v99_v16  ;;  %v104_v19 = vsub.s32 4294967266, %v99_v16 }
  0x35   :  { %v102_v20 = vshrl.u32 %v84_v15, %v100_v17  ;;  %v105_v21 = vadd.s32 127, %v104_v19  ;;  %v388_v17 = vld [vmem:[%s856_s3 + $0x8] sm:$0xff]  ;;  %v390_v19 = vld [vmem:[%s856_s3 + $0x18] sm:$0xff] }
  0x37   :  { %v103_v22 = vor.u32 %v102_v20, %v101_v18  ;;  %v106_v23 = vshll.u32 %v105_v21, 23  ;;  %v389_v18 = vld [vmem:[%s856_s3 + $0x10] sm:$0xff]  ;;  %v708_v20 = vmov 0.0  }
  0x39   :  { %v107_v24 = vor.u32 4788187, %v106_v23  ;;  %v110_v25 = vcvt.s32.f32 %v103_v22 }
  0x3b   :  { %v108_v26 = vand.u32 2147483647, %v107_v24 }
  0x3d   :  { %v111_v27 = vmul.f32 %v110_v25, %v108_v26 }
  0x3f   :  { %v112_v29 = vxor.u32 2147483648, %v111_v27 }
  0x41   :  { %v113_v30 = vsel %vm30_vm10, %v112_v29, %v111_v27 }
  0x42   :  { %v116_v32 = vsel %vm29_vm11, %v756_v1, %v113_v30 }
  0x43   :  { %697 = vcosq.f32 %v116_v32 }
  0x44   :  { %699 = vsinq.f32 %v116_v32 }
  0x50   :  { %v698_v37 = vpop.eup %697 }
  0x51   :  { %v700_v38 = vpop.eup %699  ;;  %v128_v39 = vxor.u32 2147483648, %v698_v37 }
  0x52   :  { %v125_v9 = vxor.u32 2147483648, %v700_v38 }
  0x53   :  { %v129_v40 = vsel %vm127_vm12, %v128_v39, %v700_v38  ;;  %v232_v41 = vsel %vm230_vm13, %v128_v39, %v700_v38 }
  0x54   :  { %v126_v42 = vsel %vm124_vm14, %v698_v37, %v125_v9  ;;  %v229_v43 = vsel %vm227_vm15, %v698_v37, %v125_v9 }
  0x55   :  { %v130_v44 = vsel %vm123_vm2, %v126_v42, %v129_v40  ;;  %v233_v45 = vsel %vm226_vm3, %v229_v43, %v232_v41  ;;  %v521_v40 = vld [vmem:[%s857_s5] sm:$0xf] }
  0x56   :  { %v131_v46 = vsel %vm120_vm4, nan, %v130_v44  ;;  %v234_v47 = vsel %vm120_vm4, nan, %v233_v45 }
  0x57   :  { %v235_v48 = vmul.f32 %v234_v47, %v131_v46  ;;  %v237_v49 = vmul.f32 %v131_v46, %v131_v46  ;;  %243 = vst.msk [vmem:[#allocation2 + $0x8] sm:$0xf] %vm240_vm0, %v234_v47  ;;  %241 = vst.msk [vmem:[#allocation2] sm:$0xf] %vm240_vm0, %v131_v46 }
  0x59   :  { %v238_v50 = vmul.f32 2.0, %v237_v49  ;;  %v236_v51 = vmul.f32 2.0, %v235_v48 }
  0x5b   :  { %v239_v52 = vsub.f32 1.0, %v238_v50  ;;  %242 = vst.msk [vmem:[#allocation2 + $0x4] sm:$0xf] %vm240_vm0, %v236_v51 }
  0x5d   :  { %244 = vst.msk [vmem:[#allocation2 + $0xc] sm:$0xf] %vm240_vm0, %v239_v52 }
  0x62   :  { %v250_v53 = vld [vmem:[#allocation2] sm:$0xff] }
  0x64   :  { %v251_v1 = vld [vmem:[#allocation2 + $0x8] sm:$0xff] }
  0x65   :  { %647 = vmatprep.subr.mxu0 %v251_v1 }
  0x66   :  { %648 = vmatpush3.msra.mxu0 %v251_v1 }
  0x67   :  { %649 = vmatprep.subr.mxu0 %v250_v53 }
  0x68   :  { %650 = vmatpush3.msra.mxu0 %v250_v53 }
  0x69   :  { %652 = vmatmul.mubr.msk.f32.vlgmr.msra.gmra.mxu0 %vm277_vm1, %v247_v54  ;;  %671 = vmatprep.subr.mxu0 %v708_v20 }
  0x6a   :  { %654 = vmatprep.mubr.msk.f32.mxu0 %vm277_vm1, %v248_v55 }
  0x6d   :  { %655 = vmatmul.mubr.msk.f32.gmra.mxu0 %vm277_vm1, %v249_v56  ;;  %vm709_vm1 = vmmov 0  }
  0x6e   :  { %679 = vmatprep.mubr.msk.f32.mxu0 %vm709_vm1, %v708_v20 }
  0x7d   :  { %v275_v58 = vpop.permute.xlu0 %274  ;;  %v265_v59 = vpop.permute.xlu1 %264 }
  0x81   :  { %v270_v63 = vpop.permute.xlu0 %269  ;;  %v260_v4 = vpop.permute.xlu1 %259 }
  0x85   :  { %v413_v21 = vpop.permute.xlu0 %412 }
  0x86   :  { %v408_v22 = vpop.permute.xlu1 %407 }
  0x89   :  { %v403_v25 = vpop.permute.xlu0 %402 }
  0x8a   :  { %v398_v29 = vpop.permute.xlu1 %397 }
  0x8d   :  { %v526_v41 = vpop.permute.xlu0 %525 }
 0x129   :  { %v653_v60 = vpop.f32.mrf.mxu0 }
 0x12a   :  { %v366_v2 = vadd.f32 %v653_v60, %v265_v59 }
 0x12b   :  { %v360_v61 = vpop.f32.mrf.mxu0 }
 0x12c   :  { %v361_v6 = vadd.f32 %v360_v61, %v260_v4  ;;  %v380_v10 = vmul.f32 0.01, %v366_v2 }
 0x12d   :  { %v656_v62 = vpop.f32.mrf.mxu0 }
 0x12e   :  { %v376_v3 = vadd.f32 %v656_v62, %v275_v58  ;;  %v379_v13 = vmul.f32 0.01, %v361_v6  ;;  %v384_v15 = vmax.f32 %v366_v2, %v380_v10 }
 0x12f   :  { %v370_v5 = vpop.f32.mrf.mxu0 }
 0x130   :  { %v382_v7 = vmul.f32 0.01, %v376_v3  ;;  %v371_v8 = vadd.f32 %v370_v5, %v270_v63  ;;  %v383_v16 = vmax.f32 %v361_v6, %v379_v13 }
 0x132   :  { %v381_v11 = vmul.f32 0.01, %v371_v8  ;;  %v386_v12 = vmax.f32 %v376_v3, %v382_v7 }
 0x134   :  { %v385_v14 = vmax.f32 %v371_v8, %v381_v11  ;;  %657 = vmatprep.subr.mxu1 %v386_v12 }
 0x135   :  { %658 = vmatpush3.msra.mxu1 %v386_v12 }
 0x136   :  { %659 = vmatprep.subr.mxu1 %v385_v14 }
 0x137   :  { %660 = vmatpush3.msra.mxu1 %v385_v14 }
 0x138   :  { %661 = vmatprep.subr.mxu1 %v384_v15 }
 0x139   :  { %662 = vmatpush3.msra.mxu1 %v384_v15 }
 0x13a   :  { %663 = vmatprep.subr.mxu1 %v383_v16 }
 0x13b   :  { %664 = vmatpush3.msra.mxu1 %v383_v16 }
 0x13c   :  { %666 = vmatmul.mubr.msk.f32.vlgmr.msra.gmra.mxu1 %vm415_vm5, %v388_v17 }
 0x13d   :  { %668 = vmatprep.mubr.msk.f32.mxu1 %vm415_vm5, %v389_v18 }
 0x140   :  { %669 = vmatmul.mubr.msk.f32.gmra.mxu1 %vm415_vm5, %v390_v19 }
 0x1fc   :  { %v667_v23 = vpop.f32.mrf.mxu1 }
 0x1fd   :  { %v500_v27 = vadd.f32 %v667_v23, %v403_v25 }
 0x1fe   :  { %v494_v24 = vpop.f32.mrf.mxu1 }
 0x1ff   :  { %v495_v31 = vadd.f32 %v494_v24, %v398_v29  ;;  %v514_v34 = vmul.f32 0.01, %v500_v27 }
 0x200   :  { %v670_v26 = vpop.f32.mrf.mxu1 }
 0x201   :  { %v510_v28 = vadd.f32 %v670_v26, %v413_v21  ;;  %v513_v37 = vmul.f32 0.01, %v495_v31  ;;  %v518_v39 = vmax.f32 %v500_v27, %v514_v34 }
 0x202   :  { %v504_v30 = vpop.f32.mrf.mxu1 }
 0x203   :  { %v516_v32 = vmul.f32 0.01, %v510_v28  ;;  %v505_v33 = vadd.f32 %v504_v30, %v408_v22  ;;  %v517_v9 = vmax.f32 %v495_v31, %v513_v37 }
 0x205   :  { %v520_v35 = vmax.f32 %v510_v28, %v516_v32  ;;  %v515_v36 = vmul.f32 0.01, %v505_v33 }
 0x207   :  { %v519_v38 = vmax.f32 %v505_v33, %v515_v36  ;;  %672 = vmatpush3.msra.mxu0 %v520_v35 }
 0x208   :  { %673 = vmatprep.subr.mxu0 %v708_v20 }
 0x209   :  { %674 = vmatpush3.msra.mxu0 %v519_v38 }
 0x20a   :  { %675 = vmatprep.subr.mxu0 %v708_v20 }
 0x20b   :  { %676 = vmatpush3.msra.mxu0 %v518_v39 }
 0x20c   :  { %677 = vmatprep.subr.mxu0 %v708_v20 }
 0x20d   :  { %678 = vmatpush3.msra.mxu0 %v517_v9 }
 0x20e   :  { %680 = vmatmul.mubr.msk.f32.vlgmr.msra.gmra.mxu0 %vm415_vm5, %v521_v40 }
 0x2ce   :  { %v597_v42 = vpop.f32.mrf.mxu0 }
 0x2cf   :  { %v598_v43 = vadd.f32 %v597_v42, %v526_v41 }
 0x2d0   :  { %v681_v44 = vpop.f32.mrf.mxu0 }
 0x2d1   :  { %v601_v45 = vadd.f32 %v598_v43, %v753_v0 }
 0x2d3   :  { %602 = vst.msk [vmem:[%s858_s7] sm:$0xf] %vm240_vm0, %v601_v45 }

</bundles_post_ra>
